<compile_context>
chip_gen: v6e
topology: v6e:2x2x1
jax: 0.10.0
libtpu: 0.0.40
codegen_flags: <defaults>
</compile_context>

<pallas_src>
import functools

import jax
import jax.numpy as jnp
from jax.experimental import pallas as pl
from jax.experimental.pallas import tpu as pltpu


_VMEM_GRIDLESS_LIMIT_BYTES = 2 << 20   # single-block (gridless) path only for <= 2 MiB
_XLA_FALLBACK_BYTES = 4 << 20          # below this, plain XLA sigmoid is strictly faster
_TILE_BUDGET_BYTES = 1 << 20           # <= ~1 MiB per tile buffer (v7x 64 MiB VMEM safe)


def _compute_dtype_for(dtype):
    """Only v5e lacks a native bf16 VPU/EUP path; elsewhere keep narrow floats."""
    dtype = jnp.dtype(dtype)
    if not jnp.issubdtype(dtype, jnp.floating) or dtype.itemsize >= 4:
        return dtype
    try:
        kind = jax.devices()[0].device_kind.lower()
        is_v5e = ("v5e" in kind) or ("v5 lite" in kind) or ("v5litepod" in kind)
    except Exception:
        is_v5e = True  # conservative: promote if we can't tell
    return jnp.float32 if is_v5e else dtype


def _sigmoid_kernel(x_ref, o_ref, *, compute_dtype):
    x = x_ref[...].astype(compute_dtype)
    # TODO(synk): if bundle dumps show the exact divide landing on the VALU for
    # large tiles, switch to exp(-x) + pl.reciprocal(1 + e, approx=True) (EUP)
    # after re-checking the 1e-6 tolerance.
    o_ref[...] = jax.nn.sigmoid(x).astype(o_ref.dtype)


def _sigmoid_pallas_single_block(x):
    """Gridless whole-array VMEM kernel — for tiny / ragged shapes only."""
    kern = functools.partial(_sigmoid_kernel,
                             compute_dtype=_compute_dtype_for(x.dtype))
    return pl.pallas_call(
        kern,
        out_shape=jax.ShapeDtypeStruct(x.shape, x.dtype),
        in_specs=[pl.BlockSpec(memory_space=pltpu.MemorySpace.VMEM)],
        out_specs=pl.BlockSpec(memory_space=pltpu.MemorySpace.VMEM),
    )(x)


def _pick_tile(extent, candidates):
    for c in candidates:
        if c <= extent and extent % c == 0:
            return c
    return None


def _sigmoid_pallas_tiled(x):
    """Lane-dense tiled grid path. Returns None if the shape isn't (8,128)-tileable."""
    orig_shape = x.shape
    if x.ndim == 1:
        x2 = x.reshape(1, -1)
    elif x.ndim == 2:
        x2 = x
    else:
        x2 = x.reshape(-1, x.shape[-1])
    R, C = x2.shape
    if R % 8 != 0 or C % 128 != 0:
        return None

    itemsize = jnp.dtype(x.dtype).itemsize
    tile_c = _pick_tile(C, (4096, 2048, 1024, 512, 256, 128))
    if tile_c is None:
        return None
    max_rows = max(8, _TILE_BUDGET_BYTES // (tile_c * itemsize))
    tile_r = _pick_tile(
        R, tuple(r for r in (1024, 512, 256, 128, 64, 32, 16, 8) if r <= max_rows))
    if tile_r is None:
        return None

    grid = (R // tile_r, C // tile_c)
    kern = functools.partial(_sigmoid_kernel,
                             compute_dtype=_compute_dtype_for(x.dtype))
    out = pl.pallas_call(
        kern,
        out_shape=jax.ShapeDtypeStruct((R, C), x.dtype),
        grid=grid,
        in_specs=[pl.BlockSpec((tile_r, tile_c), lambda i, j: (i, j))],
        out_specs=pl.BlockSpec((tile_r, tile_c), lambda i, j: (i, j)),
        compiler_params=pltpu.CompilerParams(
            dimension_semantics=("parallel", "parallel")),
    )(x2)
    return out.reshape(orig_shape)


def sigmoid_pallas(x):
    """Always-Pallas path (used for on-TPU validation): tiled if possible,
    otherwise gridless single-block."""
    out = _sigmoid_pallas_tiled(x)
    if out is not None:
        return out
    return _sigmoid_pallas_single_block(x)


def sigmoid(x):
    """Module-equivalent forward.  XLA's fused sigmoid is the right tool for
    anything small (a standalone Pallas elementwise kernel only pays off once
    dispatch/pipeline overhead is amortized); large inputs take the tiled
    lane-dense Pallas path."""
    if x.nbytes < _XLA_FALLBACK_BYTES:
        return jax.nn.sigmoid(x)
    out = _sigmoid_pallas_tiled(x)
    if out is not None:
        return out
    if x.nbytes <= _VMEM_GRIDLESS_LIMIT_BYTES:
        return _sigmoid_pallas_single_block(x)
    return jax.nn.sigmoid(x)  # ragged large shape: let XLA handle it


if __name__ == "__main__":
    key = jax.random.PRNGKey(0)
    # Same shape as the PyTorch spec: x1 = torch.randn(1, 16)
    x1 = jax.random.normal(key, (1, 16), dtype=jnp.float32)

    # Validate the Pallas kernel directly (gridless path for this tiny shape).
    out = sigmoid_pallas(x1)
    jax.block_until_ready(out)
    ref = jax.nn.sigmoid(x1)
    assert out.shape == (1, 16)
    assert out.dtype == jnp.float32
    assert jnp.allclose(out, ref, atol=1e-6, rtol=1e-6)

    # Validate the tiled lane-dense path on a modest (8,128)-aligned input.
    xk = jax.random.normal(jax.random.PRNGKey(1), (256, 1024), dtype=jnp.float32)
    out_t = _sigmoid_pallas_tiled(xk)
    assert out_t is not None
    jax.block_until_ready(out_t)
    assert jnp.allclose(out_t, jax.nn.sigmoid(xk), atol=1e-6, rtol=1e-6)

    # Production wrapper (falls back to XLA at the spec'd tiny size).
    out2 = sigmoid(x1)
    jax.block_until_ready(out2)
    assert jnp.allclose(out2, ref, atol=1e-6, rtol=1e-6)

    print("KERNEL_OK")
</pallas_src>

<mosaic_0001>
module attributes {stable_mosaic.version = 11 : i64} {
  func.func @_sigmoid_kernel(%arg0: memref<1x16xf32, #tpu.memory_space<vmem>>, %arg1: memref<1x16xf32, #tpu.memory_space<vmem>>) attributes {dimension_semantics = [], scalar_prefetch = 0 : i64, scratch_operands = 0 : i64, tpu.core_type = #tpu.core_type<tc>} {
    %c0 = arith.constant 0 : index
    %c0_0 = arith.constant 0 : index
    %0 = vector.load %arg0[%c0, %c0_0] : memref<1x16xf32, #tpu.memory_space<vmem>>, vector<1x16xf32>
    %1 = arith.negf %0 : vector<1x16xf32>
    %2 = math.exp %1 : vector<1x16xf32>
    %cst = arith.constant 1.000000e+00 : f32
    %3 = vector.broadcast %cst : f32 to vector<1x16xf32>
    %4 = arith.addf %3, %2 : vector<1x16xf32>
    %5 = arith.divf %3, %4 : vector<1x16xf32>
    %c0_1 = arith.constant 0 : index
    %c0_2 = arith.constant 0 : index
    %6 = vector.load %arg1[%c0_1, %c0_2] : memref<1x16xf32, #tpu.memory_space<vmem>>, vector<1x16xf32>
    tpu.vector_store %arg1[%c0_1, %c0_2], %5 {strides = array<i32>} : memref<1x16xf32, #tpu.memory_space<vmem>>, vector<1x16xf32>,
    return
  }
}

</mosaic_0001>

<bundles_post_ra>
// kernel: tpu_custom_call.1
= control target key start
LH: loop header
LB: loop body
LE: loop exit
PB: predicated region body
PF: predicated region fallthrough
CT: control target
= control target key end

     0   :  { %6 = vsyncpa [#allocation3], 0  ;;  %s114_s0 = inlined_call_operand.hbm [shape: f32[1,16], index: 0, kind: input, shape index: {}]   ;;  %s115_s1 = inlined_call_operand.hbm [shape: f32[1,16], index: 1, kind: output, shape index: {}]  }
   0x1   :  { %7 = vsyncpa [#allocation4], 0  ;;  %s96_s6 = smov [#allocation2]  }
   0x2   :  { %s14_s7 = sshll.u32 %s96_s6, 4  ;;  %s15_s7 = int_to_ptr.vmem [resolvable:$true] %s14_s7 }
   0x3   :  { %s60_s8 = scalar_lea.vmem %s15_s7, 16  ;;  %s64_s9 = scalar_lea.vmem %s15_s7, 32 }
   0x4   :  { %p61_p0 = scmp.ne.s32.totalorder %s15_s7, %s60_s8  ;;  %p65_p1 = scmp.lt.s32.totalorder %s15_s7, %s15_s7 }
   0x5   :  { %p66_p2 = scmp.lt.s32.totalorder %s64_s9, %s60_s8 }
   0x7   :  { %p67_p3 = por %p66_p2, %p65_p1 }
   0x9   :  { %p68_p4 = pnand %p67_p3, %p61_p0 }
   0xb   :  { %71 = shalt.err (!%p68_p4)
}
   0xc   :  { %17 = dma.hbm_to_vmem [thread:$0]  %s114_s0, 16, %s15_s7, [#allocation3]  }
   0xd   :  { %92 = dma.done.wait [#allocation3], 16  }
   0xe   :  { %93 = vsyncadd [#allocation3], 4294967280  ;;  %v21_v0 = vld [vmem:[#allocation2] sm:$0x1]  ;;  %s97_s12 = smov [#allocation5]   ;;  %vm28_vm0 = vcmask 122880  }
   0xf   :  { %v45_v1 = vmul.f32 -1.442695, %v21_v0  ;;  %s36_s13 = sshll.u32 %s97_s12, 4  ;;  %s37_s13 = int_to_ptr.vmem [resolvable:$true] %s36_s13 }
  0x10   :  { %s72_s14 = scalar_lea.vmem %s37_s13, 16  ;;  %s76_s15 = scalar_lea.vmem %s37_s13, 32 }
  0x11   :  { %48 = vpow2.f32 %v45_v1  ;;  %p73_p5 = scmp.ne.s32.totalorder %s37_s13, %s72_s14  ;;  %p77_p6 = scmp.lt.s32.totalorder %s37_s13, %s37_s13 }
  0x12   :  { %p78_p7 = scmp.lt.s32.totalorder %s76_s15, %s72_s14 }
  0x14   :  { %p79_p8 = por %p78_p7, %p77_p6 }
  0x16   :  { %p80_p9 = pnand %p79_p8, %p73_p5 }
  0x1e   :  { %v49_v2 = vpop.eup %48 }
  0x1f   :  { %v25_v3 = vadd.f32 1.0, %v49_v2 }
  0x21   :  { %50 = vrcp.f32 %v25_v3 }
  0x2e   :  { %v51_v4 = vpop.eup %50 }
  0x2f   :  { %29 = vst.msk [vmem:[#allocation5] sm:$0x1] %vm28_vm0, %v51_v4 }
  0x30   :  { %83 = shalt.err (!%p80_p9)
}
  0x31   :  { %39 = dma.vmem_to_hbm [thread:$0]  %s37_s13, 16, %s115_s1, [#allocation4]  }
  0x32   :  { %94 = dma.done.wait [#allocation4], 16  }
  0x33   :  { %95 = vsyncadd [#allocation4], 4294967280 }
  0x34   :  { %43 = vsyncpa [#allocation3], 1 }
  0x35   :  { %44 = vsyncpa [#allocation4], 1 }

</bundles_post_ra>
